<compile_context>
chip_gen: v6e
topology: v6e:2x2x1
jax: 0.10.0
libtpu: 0.0.40
codegen_flags: <defaults>
</compile_context>

<pallas_src>
import functools
import numpy as np

import jax
import jax.numpy as jnp
from jax.experimental import pallas as pl
from jax.experimental.pallas import tpu as pltpu


# ----------------------------------------------------------------------------
# Matrix builders (exact AdaptiveAvgPool2d / bilinear align_corners=True)
# ----------------------------------------------------------------------------
def adaptive_avg_pool_matrix(in_size: int, out_size: int) -> np.ndarray:
    """P[i, :] averages input[start_i:end_i] exactly like AdaptiveAvgPool1d."""
    P = np.zeros((out_size, in_size), np.float64)
    for i in range(out_size):
        start = (i * in_size) // out_size
        end = -((-(i + 1) * in_size) // out_size)  # ceil((i+1)*in/out)
        P[i, start:end] = 1.0 / (end - start)
    return P


def bilinear_upsample_matrix(in_size: int, out_size: int) -> np.ndarray:
    """U[o, :] gives 1-D bilinear weights with align_corners=True."""
    U = np.zeros((out_size, in_size), np.float64)
    if in_size == 1:
        U[:, 0] = 1.0
        return U
    scale = (in_size - 1) / (out_size - 1)
    for o in range(out_size):
        src = o * scale
        i0 = min(int(np.floor(src)), in_size - 1)
        i1 = min(i0 + 1, in_size - 1)
        frac = src - i0
        U[o, i0] += 1.0 - frac
        U[o, i1] += frac
    return U


# ----------------------------------------------------------------------------
# Pallas kernel: all bins fused, pool -> conv(+BN scale folded) -> +shift,relu,
# mask -> upsample.  One lane-dense (nR, HW) store per image.
# ----------------------------------------------------------------------------
def _ppm_kernel(x_ref, mpool_ref, w_ref, shift_ref, mask_ref, mup_ref, out_ref):
    x = x_ref[0]                                                    # (C, HW)
    # adaptive avg pool, all bins at once: (C, HW) @ (HW, T) -> (C, T)
    pooled = jnp.dot(x, mpool_ref[...], preferred_element_type=jnp.float32)
    # stacked 1x1 conv with BN scale folded in: (nR, C) @ (C, T) -> (nR, T)
    y = jnp.dot(w_ref[...], pooled, preferred_element_type=jnp.float32)
    # BN shift + ReLU, then zero out off-bin columns (block-diagonal mask)
    act = jnp.maximum(y + shift_ref[...], 0.0) * mask_ref[...]
    # bilinear upsample (align_corners=True), all bins: (nR, T) @ (T, HW)
    up = jnp.dot(act, mup_ref[...], preferred_element_type=jnp.float32)
    out_ref[0] = up.astype(out_ref.dtype)


def ppm_forward(x, bin_params, bins):
    """x: (N, C, H, W) float32.  Returns (N, C + len(bins)*R, H, W)."""
    N, C, H, W = x.shape
    HW = H * W
    R = bin_params[0]["weight"].shape[0]
    nb = len(bins)
    nR = nb * R
    total = sum(b * b for b in bins)

    # Lane-dense / sublane-dense output requirements (see TODO above).
    assert HW % 128 == 0, "H*W must be a multiple of 128 (pad spatially)"
    assert C % 8 == 0 and nR % 8 == 0, "channel dims must be multiples of 8"

    # ---- host-side constant construction -----------------------------------
    mpool_blocks, mup_blocks = [], []
    for b in bins:
        Ph = adaptive_avg_pool_matrix(H, b)
        Pw = adaptive_avg_pool_matrix(W, b)
        mpool_blocks.append(np.kron(Ph, Pw).T)            # (HW, b*b)
        Uh = bilinear_upsample_matrix(b, H)
        Uw = bilinear_upsample_matrix(b, W)
        mup_blocks.append(np.kron(Uh, Uw).T)              # (b*b, HW)
    mpool_all = np.concatenate(mpool_blocks, axis=1).astype(np.float32)  # (HW, T)
    mup_all = np.concatenate(mup_blocks, axis=0).astype(np.float32)      # (T, HW)

    # block mask: rows of bin k only see bin k's pooled columns
    mask = np.zeros((nR, total), np.float32)
    w_rows, shift_rows = [], []
    off = 0
    eps = 1e-5
    for k, (b, p) in enumerate(zip(bins, bin_params)):
        bb = b * b
        mask[k * R:(k + 1) * R, off:off + bb] = 1.0
        off += bb
        bn_scale = p["gamma"] / jnp.sqrt(p["running_var"] + eps)     # (R,)
        bn_shift = p["beta"] - p["running_mean"] * bn_scale          # (R,)
        w_rows.append(p["weight"].astype(jnp.float32) * bn_scale[:, None])
        shift_rows.append(bn_shift)
    w_stacked = jnp.concatenate(w_rows, axis=0).astype(jnp.float32)          # (nR, C)
    shift = jnp.concatenate(shift_rows, axis=0).reshape(nR, 1).astype(jnp.float32)

    x_flat = x.reshape(N, C, HW).astype(jnp.float32)

    up_flat = pl.pallas_call(
        _ppm_kernel,
        out_shape=jax.ShapeDtypeStruct((N, nR, HW), jnp.float32),
        grid=(N,),
        in_specs=[
            pl.BlockSpec((1, C, HW), lambda n: (n, 0, 0)),    # x (per image)
            pl.BlockSpec((HW, total), lambda n: (0, 0)),      # MpoolT_all
            pl.BlockSpec((nR, C), lambda n: (0, 0)),          # stacked conv W
            pl.BlockSpec((nR, 1), lambda n: (0, 0)),          # BN shift
            pl.BlockSpec((nR, total), lambda n: (0, 0)),      # block mask
            pl.BlockSpec((total, HW), lambda n: (0, 0)),      # Mup_all
        ],
        out_specs=pl.BlockSpec((1, nR, HW), lambda n: (n, 0, 0)),
        compiler_params=pltpu.CompilerParams(
            dimension_semantics=("parallel",),
            vmem_limit_bytes=64 * 1024 * 1024),
    )(x_flat, jnp.asarray(mpool_all), w_stacked, shift,
      jnp.asarray(mask), jnp.asarray(mup_all))

    # identity branch of the concat stays outside the kernel (no extra
    # HBM->VMEM->HBM round-trip of x through the kernel).
    out = jnp.concatenate([x_flat, up_flat], axis=1)
    return out.reshape(N, C + nR, H, W)


# ----------------------------------------------------------------------------
# Pure-JAX reference (PyTorch ordering: pool -> conv -> BN -> relu -> upsample)
# ----------------------------------------------------------------------------
def ppm_reference(x, bin_params, bins):
    N, C, H, W = x.shape
    HW = H * W
    x_flat = x.reshape(N, C, HW)
    outs = [x_flat]
    eps = 1e-5
    for b, p in zip(bins, bin_params):
        Ph = adaptive_avg_pool_matrix(H, b)
        Pw = adaptive_avg_pool_matrix(W, b)
        mpool = jnp.asarray(np.kron(Ph, Pw).astype(np.float32))      # (b*b, HW)
        Uh = bilinear_upsample_matrix(b, H)
        Uw = bilinear_upsample_matrix(b, W)
        mup = jnp.asarray(np.kron(Uh, Uw).astype(np.float32))        # (HW, b*b)
        pooled = jnp.einsum("ncs,bs->ncb", x_flat, mpool)            # (N, C, b*b)
        y = jnp.einsum("rc,ncb->nrb", p["weight"], pooled)           # (N, R, b*b)
        sc = p["gamma"] / jnp.sqrt(p["running_var"] + eps)
        sh = p["beta"] - p["running_mean"] * sc
        act = jnp.maximum(y * sc[None, :, None] + sh[None, :, None], 0.0)
        up = jnp.einsum("sb,nrb->nrs", mup, act)                     # (N, R, HW)
        outs.append(up)
    return jnp.concatenate(outs, axis=1).reshape(N, -1, H, W)


# ----------------------------------------------------------------------------
if __name__ == "__main__":
    N, C, H, W = 2, 8, 16, 16       # in_dim = 8
    R = 4                           # reduction_dim = 4
    bins = (1, 2, 3, 6)

    key = jax.random.PRNGKey(0)
    key, kx = jax.random.split(key)
    x = jax.random.normal(kx, (N, C, H, W), dtype=jnp.float32)

    bin_params = []
    for _ in bins:
        key, kw, kg, kb, km, kv = jax.random.split(key, 6)
        bin_params.append({
            "weight": jax.random.normal(kw, (R, C), dtype=jnp.float32) * 0.2,
            "gamma": jax.random.uniform(kg, (R,), minval=0.5, maxval=1.5,
                                        dtype=jnp.float32),
            "beta": jax.random.normal(kb, (R,), dtype=jnp.float32) * 0.1,
            "running_mean": jax.random.normal(km, (R,), dtype=jnp.float32) * 0.1,
            "running_var": jax.random.uniform(kv, (R,), minval=0.5, maxval=1.5,
                                              dtype=jnp.float32),
        })

    out = jax.block_until_ready(ppm_forward(x, bin_params, bins))
    ref = jax.block_until_ready(ppm_reference(x, bin_params, bins))

    assert out.shape == (N, C + len(bins) * R, H, W), out.shape
    assert np.allclose(np.asarray(out), np.asarray(ref), rtol=1e-4, atol=1e-4)

    print("KERNEL_OK")
</pallas_src>

<mosaic_0001>
module attributes {stable_mosaic.version = 11 : i64} {
  func.func @_ppm_kernel(%arg0: i32, %arg1: memref<1x8x256xf32, #tpu.memory_space<vmem>>, %arg2: memref<256x50xf32, #tpu.memory_space<vmem>>, %arg3: memref<16x8xf32, #tpu.memory_space<vmem>>, %arg4: memref<16x1xf32, #tpu.memory_space<vmem>>, %arg5: memref<16x50xf32, #tpu.memory_space<vmem>>, %arg6: memref<50x256xf32, #tpu.memory_space<vmem>>, %arg7: memref<1x16x256xf32, #tpu.memory_space<vmem>>) attributes {dimension_semantics = [#tpu.dimension_semantics<parallel>], iteration_bounds = array<i64: 2>, scalar_prefetch = 0 : i64, scratch_operands = 0 : i64, tpu.core_type = #tpu.core_type<tc>, window_params = [{transform_indices = @transform_0, window_bounds = array<i64: 1, 8, 256>}, {pipeline_mode = #tpu.pipeline_mode<synchronous>, transform_indices = @transform_1, window_bounds = array<i64: 256, 50>}, {pipeline_mode = #tpu.pipeline_mode<synchronous>, transform_indices = @transform_2, window_bounds = array<i64: 16, 8>}, {pipeline_mode = #tpu.pipeline_mode<synchronous>, transform_indices = @transform_3, window_bounds = array<i64: 16, 1>}, {pipeline_mode = #tpu.pipeline_mode<synchronous>, transform_indices = @transform_4, window_bounds = array<i64: 16, 50>}, {pipeline_mode = #tpu.pipeline_mode<synchronous>, transform_indices = @transform_5, window_bounds = array<i64: 50, 256>}, {transform_indices = @transform_6, window_bounds = array<i64: 1, 16, 256>}]} {
    %c0 = arith.constant 0 : index
    %c0_0 = arith.constant 0 : index
    %c0_1 = arith.constant 0 : index
    %0 = vector.load %arg1[%c0, %c0_0, %c0_1] : memref<1x8x256xf32, #tpu.memory_space<vmem>>, vector<1x8x256xf32>
    %1 = vector.shape_cast %0 : vector<1x8x256xf32> to vector<8x256xf32>
    %c0_2 = arith.constant 0 : index
    %c0_3 = arith.constant 0 : index
    %2 = vector.load %arg2[%c0_2, %c0_3] : memref<256x50xf32, #tpu.memory_space<vmem>>, vector<256x50xf32>
    %cst = arith.constant dense<0.000000e+00> : vector<8x50xf32>
    %3 = tpu.matmul %1, %2, %cst {dimension_numbers = #tpu.dot_dimension_numbers<[1], [0], [0], [1], [0, 0, 1, 1], [], []>} : vector<8x256xf32>, vector<256x50xf32>, vector<8x50xf32> -> vector<8x50xf32>
    %c0_4 = arith.constant 0 : index
    %c0_5 = arith.constant 0 : index
    %4 = vector.load %arg3[%c0_4, %c0_5] : memref<16x8xf32, #tpu.memory_space<vmem>>, vector<16x8xf32>
    %cst_6 = arith.constant dense<0.000000e+00> : vector<16x50xf32>
    %5 = tpu.matmul %4, %3, %cst_6 {dimension_numbers = #tpu.dot_dimension_numbers<[1], [0], [0], [1], [0, 0, 1, 1], [], []>} : vector<16x8xf32>, vector<8x50xf32>, vector<16x50xf32> -> vector<16x50xf32>
    %c0_7 = arith.constant 0 : index
    %c0_8 = arith.constant 0 : index
    %6 = vector.load %arg4[%c0_7, %c0_8] : memref<16x1xf32, #tpu.memory_space<vmem>>, vector<16x1xf32>
    %7 = vector.broadcast %6 : vector<16x1xf32> to vector<16x50xf32>
    %8 = arith.addf %5, %7 : vector<16x50xf32>
    %cst_9 = arith.constant 0.000000e+00 : f32
    %9 = vector.broadcast %cst_9 : f32 to vector<16x50xf32>
    %10 = arith.maximumf %8, %9 : vector<16x50xf32>
    %c0_10 = arith.constant 0 : index
    %c0_11 = arith.constant 0 : index
    %11 = vector.load %arg5[%c0_10, %c0_11] : memref<16x50xf32, #tpu.memory_space<vmem>>, vector<16x50xf32>
    %12 = arith.mulf %10, %11 : vector<16x50xf32>
    %c0_12 = arith.constant 0 : index
    %c0_13 = arith.constant 0 : index
    %13 = vector.load %arg6[%c0_12, %c0_13] : memref<50x256xf32, #tpu.memory_space<vmem>>, vector<50x256xf32>
    %cst_14 = arith.constant dense<0.000000e+00> : vector<16x256xf32>
    %14 = tpu.matmul %12, %13, %cst_14 {dimension_numbers = #tpu.dot_dimension_numbers<[1], [0], [0], [1], [0, 0, 1, 1], [], []>} : vector<16x50xf32>, vector<50x256xf32>, vector<16x256xf32> -> vector<16x256xf32>
    %c0_15 = arith.constant 0 : index
    %c0_16 = arith.constant 0 : index
    %c0_17 = arith.constant 0 : index
    %15 = vector.load %arg7[%c0_15, %c0_16, %c0_17] : memref<1x16x256xf32, #tpu.memory_space<vmem>>, vector<1x16x256xf32>
    %16 = vector.shape_cast %15 : vector<1x16x256xf32> to vector<16x256xf32>
    %17 = vector.shape_cast %14 : vector<16x256xf32> to vector<1x16x256xf32>
    tpu.vector_store %arg7[%c0_15, %c0_16, %c0_17], %17 {strides = array<i32>} : memref<1x16x256xf32, #tpu.memory_space<vmem>>, vector<1x16x256xf32>,
    return
  }
  func.func @transform_0(%arg0: i32) -> (i32, i32, i32) {
    %c0_i32 = arith.constant 0 : i32
    %c0_i32_0 = arith.constant 0 : i32
    %c0_i32_1 = arith.constant 0 : i32
    return %arg0, %c0_i32, %c0_i32_0 : i32, i32, i32
  }
  func.func @transform_1(%arg0: i32) -> (i32, i32) {
    %c0_i32 = arith.constant 0 : i32
    %c0_i32_0 = arith.constant 0 : i32
    %c0_i32_1 = arith.constant 0 : i32
    return %c0_i32, %c0_i32_0 : i32, i32
  }
  func.func @transform_2(%arg0: i32) -> (i32, i32) {
    %c0_i32 = arith.constant 0 : i32
    %c0_i32_0 = arith.constant 0 : i32
    %c0_i32_1 = arith.constant 0 : i32
    return %c0_i32, %c0_i32_0 : i32, i32
  }
  func.func @transform_3(%arg0: i32) -> (i32, i32) {
    %c0_i32 = arith.constant 0 : i32
    %c0_i32_0 = arith.constant 0 : i32
    %c0_i32_1 = arith.constant 0 : i32
    return %c0_i32, %c0_i32_0 : i32, i32
  }
  func.func @transform_4(%arg0: i32) -> (i32, i32) {
    %c0_i32 = arith.constant 0 : i32
    %c0_i32_0 = arith.constant 0 : i32
    %c0_i32_1 = arith.constant 0 : i32
    return %c0_i32, %c0_i32_0 : i32, i32
  }
  func.func @transform_5(%arg0: i32) -> (i32, i32) {
    %c0_i32 = arith.constant 0 : i32
    %c0_i32_0 = arith.constant 0 : i32
    %c0_i32_1 = arith.constant 0 : i32
    return %c0_i32, %c0_i32_0 : i32, i32
  }
  func.func @transform_6(%arg0: i32) -> (i32, i32, i32) {
    %c0_i32 = arith.constant 0 : i32
    %c0_i32_0 = arith.constant 0 : i32
    %c0_i32_1 = arith.constant 0 : i32
    return %arg0, %c0_i32, %c0_i32_0 : i32, i32, i32
  }
}

</mosaic_0001>

<bundles_post_ra>
// kernel: tpu_custom_call.1
= control target key start
LH: loop header
LB: loop body
LE: loop exit
PB: predicated region body
PF: predicated region fallthrough
CT: control target
= control target key end

     0   :  { %11 = vsyncpa [#allocation3], 0  ;;  %s1114_s0 = inlined_call_operand.vmem [shape: f32[2,8,256], index: 0, kind: input, shape index: {}]   ;;  %s1115_s1 = inlined_call_operand.vmem [shape: f32[256,50], index: 1, kind: input, shape index: {}]   ;;  %s1116_s2 = inlined_call_operand.vmem [shape: f32[16,8], index: 2, kind: input, shape index: {}]   ;;  %s1117_s3 = inlined_call_operand.vmem [shape: f32[16,1], index: 3, kind: input, shape index: {}]   ;;  %s1118_s4 = inlined_call_operand.vmem [shape: f32[16,50], index: 4, kind: input, shape index: {}]   ;;  %s1119_s5 = inlined_call_operand.vmem [shape: f32[50,256], index: 5, kind: input, shape index: {}]   ;;  %s1120_s6 = inlined_call_operand.hbm [shape: f32[2,16,256], index: 6, kind: output, shape index: {}]  }
   0x1   :  { %13 = vsyncpa [#allocation3 + $0x1], 0  ;;  %s850_s21 = smov 0   ;;  %s852_s22 = smov 0  }
   0x2   :  { %s854_s23 = smov 0   ;;  %s856_s24 = smov 0  }
   0x3 LB: > { %s871_s25 = sadd.s32 4294967295, %s808_s24   ;;  %s641_s26 = sadd.s32 4294967294, %s808_s24   ;;  %s808_s24 = sphi %s856_s24, %s1126_s24   ;;  %s804_s23 = sphi %s854_s23, %s1125_s23   ;;  %s800_s22 = sphi %s852_s22, %s1124_s22   ;;  %s796_s21 = sphi %s850_s21, %s1123_s21  }
   0x4   : > { %s875_s27 = sadd.s32 1, %s808_s24   ;;  %s157_s28 = sadd.s32 1, %s804_s23 }
   0x5   : > { %s154_s29 = ssub.s32 %s808_s24, %s875_s27  ;;  %p167_p0 = scmp.ne.s32.totalorder %s804_s23, %s800_s22 }
   0x6   : > { %p155_p1 = scmp.eq.s32.totalorder %s154_s29, 0  ;;  %p168_p2 = scmp.eq.s32.totalorder %s871_s25, 1 }
   0x7   : > { %p173_p3 = scmp.ne.s32.totalorder %s800_s22, %s796_s21  ;;  %p174_p4 = scmp.eq.s32.totalorder %s641_s26, 1 }
   0x8   : > { %s886_s30 = scalar_select %p155_p1, %s804_s23, %s157_s28  }
   0x9   : > { %p888_p5 = por %p168_p2, %p167_p0  ;;  %p892_p6 = por %p174_p4, %p173_p3 }
   0xa   : > { %p644_p7 = scmp.ge.s32.totalorder %s808_s24, 1  ;;  %p215_p8 = scmp.lt.s32.totalorder %s808_s24, 3 }
   0xc   : > { %p216_p9 = pnand %p644_p7, %p215_p8 }
   0xd   : > { %p245_p10 = scmp.lt.s32.totalorder (!%p216_p9), %s871_s25, 1  ;;  %s242_s15 = sand.u32 (!%p216_p9), 1, %s800_s22  }
   0xe   : > { %219 = sbr.rel (%p216_p9) target bundleno = 665 (0x299), region = 44  ;;  %s645_s16 = sshll.u32 (!%p216_p9), %s242_s15, 5 }
   0xf   : > { %s244_s17 = scalar_lea.vmem (!%p216_p9), [#allocation2], %s645_s16  ;;  %s660_s20 = sshll.u32 (!%p216_p9), %s871_s25, 9 }
  0x10   : > { %s1072_s29 = scalar_lea.hbm (!%p216_p9), %s1120_s6, %s660_s20  ;;  %s1074_s10 = scalar_lea.sflag (!%p216_p9), [#allocation3], %s242_s15 }
  0x13   : > { %v283_v0 = vld [vmem:[%s1115_s1 + $0xf8] sm:$0xff]  ;;  %v282_v2 = vld [vmem:[%s1115_s1 + $0xf0] sm:$0xff]  ;;  %v281_v4 = vld [vmem:[%s1115_s1 + $0xe8] sm:$0xff]  ;;  %s246_s19 = scalar_select %p245_p10, %s871_s25, 1  ;;  %vm368_vm0 = vcmask 64512   ;;  %v810_v36 = vmov 0  }
  0x14   : > { %v267_v1 = vld [vmem:[%s1115_s1 + $0x78] sm:$0xff]  ;;  %661 = vmatprep.subr.mxu0 %v283_v0  ;;  %v266_v3 = vld [vmem:[%s1115_s1 + $0x70] sm:$0xff]  ;;  %v265_v5 = vld [vmem:[%s1115_s1 + $0x68] sm:$0xff]  ;;  %747 = vset.pattern.permute.xlu0 %v810_v36  ;;  %vm477_vm1 = vcmask 1041408   ;;  %v811_v56 = vmov 0.0   ;;  %vm470_vm2 = vcmask 408576  }
  0x15   : > { %662 = vmatpush3.msra.mxu0 %v267_v1  ;;  %v280_v6 = vld [vmem:[%s1115_s1 + $0xe0] sm:$0xff]  ;;  %s659_s9 = sshll.u32 %s246_s19, 4  ;;  %v279_v8 = vld [vmem:[%s1115_s1 + $0xd8] sm:$0xff]  ;;  %v278_v10 = vld [vmem:[%s1115_s1 + $0xd0] sm:$0xff]  ;;  %s579_s19 = sshll.u32 %s244_s17, 4  ;;  %s1067_s19 = int_to_ptr.vmem [resolvable:$true] %s579_s19 }
  0x16   : > { %663 = vmatprep.subr.mxu0 %v282_v2  ;;  %v264_v7 = vld [vmem:[%s1115_s1 + $0x60] sm:$0xff]  ;;  %v263_v9 = vld [vmem:[%s1115_s1 + $0x58] sm:$0xff]  ;;  %s933_s18 = scalar_lea.vmem %s1114_s0, %s659_s9  ;;  %v262_v11 = vld [vmem:[%s1115_s1 + $0x50] sm:$0xff]  ;;  %s748_s9 = scalar_lea.vmem %s1067_s19, 512 }
  0x17   : > { %664 = vmatpush3.msra.mxu0 %v266_v3  ;;  %v277_v12 = vld [vmem:[%s1115_s1 + $0xc8] sm:$0xff]  ;;  %v276_v15 = vld [vmem:[%s1115_s1 + $0xc0] sm:$0xff]  ;;  %v275_v17 = vld [vmem:[%s1115_s1 + $0xb8] sm:$0xff]  ;;  %p749_p11 = scmp.ne.s32.totalorder %s1067_s19, %s748_s9  ;;  %s812_s25 = smov [#allocation2]  }
  0x18   : > { %665 = vmatprep.subr.mxu0 %v281_v4  ;;  %v251_v13 = vld [vmem:[%s933_s18 + $0x8] sm:$0xff]  ;;  %v260_v16 = vld [vmem:[%s1115_s1 + $0x40] sm:$0xff]  ;;  %v259_v18 = vld [vmem:[%s1115_s1 + $0x38] sm:$0xff]  ;;  %s752_s11 = sshll.u32 %s812_s25, 4  ;;  %s753_s11 = int_to_ptr.vmem [resolvable:$false] %s752_s11 }
  0x19   : > { %666 = vmatpush3.msra.mxu0 %v265_v5  ;;  %v261_v14 = vld [vmem:[%s1115_s1 + $0x48] sm:$0xff]  ;;  %348 = vmatprep.mubr.f32.mxu0 %v251_v13  ;;  %v274_v19 = vld [vmem:[%s1115_s1 + $0xb0] sm:$0xff]  ;;  %v272_v23 = vld [vmem:[%s1115_s1 + $0xa0] sm:$0xff]  ;;  %p750_p12 = pnand %p749_p11, %p888_p5  ;;  %p755_p0 = scmp.lt.s32.totalorder %s1067_s19, %s753_s11 }
  0x1a   : > { %667 = vmatprep.subr.mxu0 %v280_v6  ;;  %v258_v20 = vld [vmem:[%s1115_s1 + $0x30] sm:$0xff]  ;;  %v273_v21 = vld [vmem:[%s1115_s1 + $0xa8] sm:$0xff]  ;;  %v256_v24 = vld [vmem:[%s1115_s1 + $0x20] sm:$0xff] }
  0x1b   : > { %668 = vmatpush3.msra.mxu0 %v264_v7  ;;  %v257_v22 = vld [vmem:[%s1115_s1 + $0x28] sm:$0xff]  ;;  %v271_v25 = vld [vmem:[%s1115_s1 + $0x98] sm:$0xff]  ;;  %v270_v27 = vld [vmem:[%s1115_s1 + $0x90] sm:$0xff]  ;;  %p751_p13 = pneg %p750_p12 }
  0x1c   : > { %669 = vmatprep.subr.mxu0 %v279_v8  ;;  %v255_v26 = vld [vmem:[%s1115_s1 + $0x18] sm:$0xff]  ;;  %v254_v28 = vld [vmem:[%s1115_s1 + $0x10] sm:$0xff]  ;;  %v269_v29 = vld [vmem:[%s1115_s1 + $0x88] sm:$0xff] }
  0x1d   : > { %670 = vmatpush3.msra.mxu0 %v263_v9  ;;  %v253_v30 = vld [vmem:[%s1115_s1 + $0x8] sm:$0xff]  ;;  %v268_v31 = vld [vmem:[%s1115_s1 + $0x80] sm:$0xff]  ;;  %v467_v44 = vld [vmem:[%s1119_s5 + $0x58] sm:$0xff] }
  0x1e   : > { %671 = vmatprep.subr.mxu0 %v278_v10  ;;  %v252_v32 = vld [vmem:[%s1115_s1] sm:$0xff]  ;;  %v357_v37 = vld [vmem:[%s1117_s3 + $0x8] sm:$0xff]  ;;  %v466_v45 = vld [vmem:[%s1119_s5 + $0x50] sm:$0xff] }
  0x1f   : > { %672 = vmatpush3.msra.mxu0 %v262_v11  ;;  %v250_v33 = vld [vmem:[%s933_s18] sm:$0xff]  ;;  %v355_v41 = vld [vmem:[%s1116_s2 + $0x8] sm:$0xff]  ;;  %v463_v48 = vld [vmem:[%s1119_s5 + $0x38] sm:$0xff]  ;;  %s754_s18 = scalar_lea.vmem %s753_s11, 1024 }
  0x20   : > { %673 = vmatprep.subr.mxu0 %v277_v12  ;;  %v354_v34 = vld [vmem:[%s1116_s2] sm:$0xff]  ;;  %v469_v42 = vld [vmem:[%s1119_s5 + $0x68] sm:$0x3]  ;;  %v462_v49 = vld [vmem:[%s1119_s5 + $0x30] sm:$0xff]  ;;  %p756_p1 = scmp.lt.s32.totalorder %s754_s18, %s748_s9 }
  0x21   : > { %674 = vmatpush3.msra.mxu0 %v261_v14  ;;  %701 = vmatprep.mubr.msk.f32.mxu1 %vm368_vm0, %v354_v34  ;;  %v356_v35 = vld [vmem:[%s1117_s3] sm:$0xff]  ;;  %v465_v46 = vld [vmem:[%s1119_s5 + $0x48] sm:$0xff]  ;;  %v459_v52 = vld [vmem:[%s1119_s5 + $0x18] sm:$0xff] }
  0x22   : > { %675 = vmatprep.subr.mxu0 %v276_v15  ;;  %360 = vperm.xlu0 %747, %v356_v35   ;;  %v468_v43 = vld [vmem:[%s1119_s5 + $0x60] sm:$0x3]  ;;  %v461_v50 = vld [vmem:[%s1119_s5 + $0x28] sm:$0xff]  ;;  %v458_v53 = vld [vmem:[%s1119_s5 + $0x10] sm:$0xff]  ;;  %p757_p2 = por %p756_p1, %p755_p0 }
  0x23   : > { %676 = vmatpush3.msra.mxu0 %v260_v16  ;;  %v464_v47 = vld [vmem:[%s1119_s5 + $0x40] sm:$0xff]  ;;  %v457_v54 = vld [vmem:[%s1119_s5 + $0x8] sm:$0xff] }
  0x24   : > { %677 = vmatprep.subr.mxu0 %v275_v17  ;;  %v460_v51 = vld [vmem:[%s1119_s5 + $0x20] sm:$0xff]  ;;  %v453_v3 = vld [vmem:[%s1118_s4 + $0x8] sm:$0xff]  ;;  %p758_p3 = pnand %p757_p2, %p751_p13 }
  0x25   : > { %678 = vmatpush3.msra.mxu0 %v259_v18  ;;  %v456_v55 = vld [vmem:[%s1119_s5] sm:$0xff] }
  0x26   : > { %679 = vmatprep.subr.mxu0 %v274_v19  ;;  %365 = vperm.xlu0 %747, %v357_v37   ;;  %v452_v63 = vld [vmem:[%s1118_s4] sm:$0xff] }
  0x27   : > { %680 = vmatpush3.msra.mxu0 %v258_v20 }
  0x28   : > { %681 = vmatprep.subr.mxu0 %v273_v21 }
  0x29   : > { %682 = vmatpush3.msra.mxu0 %v257_v22 }
  0x2a   : > { %683 = vmatprep.subr.mxu0 %v272_v23 }
  0x2b   : > { %684 = vmatpush3.msra.mxu0 %v256_v24 }
  0x2c   : > { %685 = vmatprep.subr.mxu0 %v271_v25 }
  0x2d   : > { %686 = vmatpush3.msra.mxu0 %v255_v26 }
  0x2e   : > { %687 = vmatprep.subr.mxu0 %v270_v27 }
  0x2f   : > { %688 = vmatpush3.msra.mxu0 %v254_v28 }
  0x30   : > { %689 = vmatprep.subr.mxu0 %v269_v29 }
  0x31   : > { %690 = vmatpush3.msra.mxu0 %v253_v30 }
  0x32   : > { %691 = vmatprep.subr.mxu0 %v268_v31 }
  0x33   : > { %692 = vmatpush3.msra.mxu0 %v252_v32 }
  0x34   : > { %349 = vmatmul.mubr.f32.vlgmr.msra.gmra.mxu0 %v250_v33 }
  0x9d   : > { %v361_v57 = vpop.permute.xlu0 %360 }
  0xa1   : > { %v366_v58 = vpop.permute.xlu0 %365 }
  0xf4   : > { %v693_v38 = vpop.f32.mrf.mxu0 }
  0xf6   : > { %v694_v39 = vpop.f32.mrf.mxu0 }
  0xf7   : > { %v695_v40 = vadd.f32 %v694_v39, %v693_v38 }
  0xf9   : > { %699 = vmatprep.subr.mxu1 %v695_v40 }
  0xfa   : > { %700 = vmatpush3.msra.mxu1 %v695_v40 }
  0xfb   : > { %702 = vmatmul.mubr.msk.f32.vlgmr.msra.gmra.mxu1 %vm368_vm0, %v355_v41  ;;  %650 = vmatprep.subr.msk.mxu1 %vm477_vm1, %v469_v42 }
  0xfc   : > { %651 = vmatpush1.msk.msra.mxu1 %vm477_vm1, %v468_v43  ;;  %548 = vmatprep.mubr.f32.mxu1 %v811_v56 }
  0xfd   : > { %504 = vmatprep.subr.mxu1 %v467_v44 }
  0xfe   : > { %505 = vmatpush1.msra.mxu1 %v466_v45 }
  0xff   : > { %506 = vmatprep.subr.mxu1 %v465_v46 }
 0x100   : > { %507 = vmatpush1.msra.mxu1 %v464_v47 }
 0x101   : > { %508 = vmatprep.subr.mxu1 %v463_v48 }
 0x102   : > { %509 = vmatpush1.msra.mxu1 %v462_v49 }
 0x103   : > { %510 = vmatprep.subr.mxu1 %v461_v50 }
 0x104   : > { %511 = vmatpush1.msra.mxu1 %v460_v51 }
 0x105   : > { %512 = vmatprep.subr.mxu1 %v459_v52 }
 0x106   : > { %513 = vmatpush1.msra.mxu1 %v458_v53 }
 0x107   : > { %514 = vmatprep.subr.mxu1 %v457_v54 }
 0x108   : > { %515 = vmatpush1.msra.mxu1 %v456_v55 }
 0x1bb   : > { %v703_v59 = vpop.f32.mrf.mxu1 }
 0x1bc   : > { %v447_v61 = vadd.f32 %v703_v59, %v366_v58 }
 0x1bd   : > { %v441_v60 = vpop.f32.mrf.mxu1 }
 0x1be   : > { %v442_v62 = vadd.f32 %v441_v60, %v361_v57  ;;  %v451_v1 = vmax.f32 %v447_v61, 0.0 }
 0x1c0   : > { %v450_v0 = vmax.f32 %v442_v62, 0.0  ;;  %v455_v4 = vmul.f32 %v453_v3, %v451_v1 }
 0x1c2   : > { %v454_v2 = vmul.f32 %v452_v63, %v450_v0 }
 0x1c4   : > { %652 = vmatmul.mubr.msk.f32.vlgmr.msra.gmra.mxu1 %vm470_vm2, %v454_v2 }
 0x1c5   : > { %554 = vmatprep.mubr.f32.mxu1 %v811_v56 }
 0x1c8   : > { %653 = vmatmul.mubr.msk.f32.gmra.mxu1 %vm470_vm2, %v455_v4 }
 0x284   : > { %v550_v5 = vpop.f32.mrf.mxu1 }
 0x285   : > { %561 = vst [vmem:[%s244_s17] sm:$0xff] %v550_v5 }
 0x286   : > { %v552_v6 = vpop.f32.mrf.mxu1 }
 0x287   : > { %562 = vst [vmem:[%s244_s17 + $0x8] sm:$0xff] %v552_v6 }
 0x288   : > { %v556_v7 = vpop.f32.mrf.mxu1 }
 0x289   : > { %563 = vst [vmem:[%s244_s17 + $0x10] sm:$0xff] %v556_v7 }
 0x28a   : > { %v558_v8 = vpop.f32.mrf.mxu1 }
 0x28b   : > { %564 = vst [vmem:[%s244_s17 + $0x18] sm:$0xff] %v558_v8 }
 0x28c   : > { %761 = shalt.err (!%p758_p3)
}
 0x28d   : > { %s762_s12 = scalar_lea.hbm %s1072_s29, 512  ;;  %s766_s15 = scalar_lea.hbm %s1120_s6, 1024 }
 0x28e   : > { %p763_p4 = scmp.ne.s32.totalorder %s1072_s29, %s762_s12  ;;  %p767_p9 = scmp.lt.s32.totalorder %s1072_s29, %s1120_s6 }
 0x28f   : > { %p768_p10 = scmp.lt.s32.totalorder %s766_s15, %s762_s12 }
 0x290   : > { %p764_p7 = pnand %p763_p4, %p888_p5 }
 0x291   : > { %p769_p11 = por %p768_p10, %p767_p9 }
 0x292   : > { %p765_p8 = pneg %p764_p7 }
 0x294   : > { %p770_p12 = pnand %p769_p11, %p765_p8 }
 0x296   : > { %773 = shalt.err (!%p770_p12)
}
 0x297   : > { %s813_s20 = smov 256   ;;  %s814_s26 = smov 16  }
 0x298   : > { %704 = dma.vmem_to_hbm [thread:$0]  (%p888_p5), %s1067_s19, 512, %s1072_s29, %s1074_s10, %s813_s20, %s813_s20, %s814_s26  }
 0x299 PF: > { %p710_p13 = scmp.ge.s32.totalorder %s808_s24, 2  ;;  %s594_s28 = sand.u32 1, %s796_s21  }
 0x29a   : > { %s595_s9 = scalar_lea.sflag [#allocation3], %s594_s28 }
 0x29b   : > { %p707_p0 = pnand %p710_p13, %p892_p6 }
 0x29d   : > { %p708_p1 = pneg %p707_p0 }
 0x29f   : > { %791 = dma.done.wait (%p708_p1), %s595_s9, 512  }
 0x2a0   : > { %793 = vsyncadd (%p708_p1), %s595_s9, 4294966784  ;;  %p16_p2 = scmp.ge.s32.totalorder %s875_s27, 4   ;;  %s1123_s21 = smov %s800_s22 }
 0x2a1   : > { %s1124_s22 = smov %s804_s23  ;;  %s1125_s23 = smov %s886_s30 }
 0x2a2   : > { %s1126_s24 = smov %s875_s27  ;;  %18 = sbr.rel (!%p16_p2) target bundleno = 3 (0x3), region = 79 }
 0x2a7   :  { %600 = vsyncpa [#allocation3], 1 }
 0x2a8   :  { %602 = vsyncpa [#allocation3 + $0x1], 1 }

</bundles_post_ra>
